<compile_context>
chip_gen: v6e
topology: v6e:2x2x1
jax: 0.10.0
libtpu: 0.0.40
codegen_flags: <defaults>
</compile_context>

<pallas_src>
import functools
import math
import warnings

import jax
import jax.numpy as jnp
from jax.experimental import pallas as pl
from jax.experimental.pallas import tpu as pltpu


# ---------------------------------------------------------------------------
# Kernels
# ---------------------------------------------------------------------------
def _add_pe_batched_kernel(x_ref, pe_ref, o_ref):
    # x/o blocks: (B, tn, Dp); pe block: (tn, Dp) -> broadcast over the batch.
    o_ref[...] = x_ref[...] + pe_ref[...]


def _add_pe_kernel(x_ref, pe_ref, o_ref):
    # Blocks are (tn, Dp) -- the leading batch dim is squeezed by the BlockSpec.
    o_ref[...] = x_ref[...] + pe_ref[...]


# ---------------------------------------------------------------------------
# Host-side helpers
# ---------------------------------------------------------------------------
@functools.lru_cache(maxsize=None)
def _sinusoidal_pe(N: int, D: int, dtype_str: str) -> jax.Array:
    """pe[n, 2k] = sin(n / 10000^(2k/D)); pe[n, 2k+1] = cos(...). Cached per (N, D, dtype)."""
    position = jnp.arange(N, dtype=jnp.float32)[:, None]                    # (N, 1)
    div_term = jnp.exp(
        jnp.arange(0, D, 2, dtype=jnp.float32) * (-math.log(10000.0) / D)   # (ceil(D/2),)
    )
    angles = position * div_term                                            # (N, ceil(D/2))
    pe = jnp.zeros((N, D), dtype=jnp.float32)
    pe = pe.at[:, 0::2].set(jnp.sin(angles))
    pe = pe.at[:, 1::2].set(jnp.cos(angles[:, : D // 2]))
    # Cast to x.dtype (output keeps x.dtype). For bf16 the add is in bf16; the
    # PyTorch module would promote to fp32 -- tiny difference, f32 path exact.
    return pe.astype(jnp.dtype(dtype_str))


def _lane_fold(N: int, D: int) -> int:
    """Smallest k with (k*D) % 128 == 0 and N % k == 0, else 1 (no reshape)."""
    if D % 128 == 0:
        return 1
    k = 128 // math.gcd(D, 128)
    if k > 1 and N % k == 0:
        return k
    return 1


def _pick_rows(n_rows: int, row_bytes: int, pack: int, target_bytes: int) -> int:
    """Largest row-tile (multiple of the sublane pack, or the full extent) within budget."""
    budget_rows = target_bytes // max(1, row_bytes)
    if budget_rows >= n_rows or n_rows <= pack:
        return n_rows                       # full extent is always a legal block
    return max(pack, (int(budget_rows) // pack) * pack)


# ---------------------------------------------------------------------------
# Public wrapper
# ---------------------------------------------------------------------------
def positional_encoding(x: jax.Array) -> jax.Array:
    """x: (B, N, D) float array -> x + sinusoidal positional encoding.

    For true in-place HBM reuse, call via jax.jit(positional_encoding, donate_argnums=0).
    """
    B, N, D = x.shape
    itemsize = jnp.dtype(x.dtype).itemsize
    pe = _sinusoidal_pe(N, D, str(jnp.dtype(x.dtype)))

    # Lane-dense layout: make the last dim a multiple of 128 when possible.
    k = _lane_fold(N, D)
    Np, Dp = N // k, D * k
    x_in = x.reshape(B, Np, Dp) if k > 1 else x
    pe_in = pe.reshape(Np, Dp) if k > 1 else pe

    pack = max(8, 32 // itemsize)          # sublane pack: 8 f32 / 16 bf16 / 32 int8
    target_bytes = 4 << 20                 # ~4 MiB tiles -> near HBM roofline

    # Fold batch into the block when even the minimal folded tile fits the budget.
    fold_batch = B * min(pack, Np) * Dp * itemsize <= target_bytes

    if fold_batch:
        tn = _pick_rows(Np, B * Dp * itemsize, pack, target_bytes)
        grid = (pl.cdiv(Np, tn),)
        x_spec = pl.BlockSpec((B, tn, Dp), lambda n: (0, n, 0))
        pe_spec = pl.BlockSpec((tn, Dp), lambda n: (n, 0))
        out_spec = pl.BlockSpec((B, tn, Dp), lambda n: (0, n, 0))
        kernel = _add_pe_batched_kernel
        dims = ("parallel",)
        blk_bytes = B * tn * Dp * itemsize
        pe_blk_bytes = tn * Dp * itemsize
    else:
        tn = _pick_rows(Np, Dp * itemsize, pack, target_bytes)
        grid = (pl.cdiv(Np, tn), B)        # batch innermost -> pe tile reused B times
        x_spec = pl.BlockSpec((pl.Squeezed(), tn, Dp), lambda n, b: (b, n, 0))
        pe_spec = pl.BlockSpec((tn, Dp), lambda n, b: (n, 0))
        out_spec = pl.BlockSpec((pl.Squeezed(), tn, Dp), lambda n, b: (b, n, 0))
        kernel = _add_pe_kernel
        # Megacore split lands on the (large) n-tile axis, not a tiny/odd B.
        dims = ("parallel", "arbitrary")
        blk_bytes = tn * Dp * itemsize
        pe_blk_bytes = tn * Dp * itemsize

    # Double-buffered x-in + x-out + pe, plus slack; clamp well under v7x's
    # 64 MiB physical VMEM, and above v5e's 16 MiB scoped default.
    vmem_limit = int(min(max(4 * blk_bytes + 2 * pe_blk_bytes + (4 << 20), 32 << 20), 60 << 20))

    out = pl.pallas_call(
        kernel,
        out_shape=jax.ShapeDtypeStruct(x_in.shape, x.dtype),
        grid_spec=pltpu.PrefetchScalarGridSpec(
            num_scalar_prefetch=0,
            grid=grid,
            in_specs=[x_spec, pe_spec],
            out_specs=out_spec,
        ),
        compiler_params=pltpu.CompilerParams(
            dimension_semantics=dims,
            vmem_limit_bytes=vmem_limit,
        ),
        input_output_aliases={0: 0},  # reuse x's HBM buffer when the caller donates x
    )(x_in, pe_in)

    return out.reshape(B, N, D) if k > 1 else out


# ---------------------------------------------------------------------------
# Reference + self-test
# ---------------------------------------------------------------------------
def _reference(x: jax.Array) -> jax.Array:
    B, N, D = x.shape
    position = jnp.arange(N, dtype=jnp.float32)[:, None]
    div_term = jnp.exp(jnp.arange(0, D, 2, dtype=jnp.float32) * (-math.log(10000.0) / D))
    pe = jnp.zeros((N, D), dtype=jnp.float32)
    pe = pe.at[:, 0::2].set(jnp.sin(position * div_term))
    pe = pe.at[:, 1::2].set(jnp.cos(position * div_term))
    return x + pe[None].astype(x.dtype)


if __name__ == "__main__":
    warnings.filterwarnings("ignore", message="Some donated buffers were not usable")

    key = jax.random.PRNGKey(0)
    B, N, D = 2, 8, 32
    x = jax.random.normal(key, (B, N, D), dtype=jnp.float32)

    ref = _reference(x)
    jax.block_until_ready(ref)

    # Donate x so input_output_aliases={0: 0} actually reuses the HBM buffer.
    pe_fn = jax.jit(positional_encoding, donate_argnums=0)
    out = pe_fn(x)
    jax.block_until_ready(out)

    assert out.shape == (B, N, D)
    assert jnp.allclose(out, ref, atol=1e-5, rtol=1e-5), "mismatch vs reference"

    print("KERNEL_OK")
</pallas_src>

<mosaic_0001>
module attributes {stable_mosaic.version = 11 : i64} {
  func.func @_add_pe_batched_kernel(%arg0: i32, %arg1: memref<2x2x128xf32, #tpu.memory_space<vmem>>, %arg2: memref<2x128xf32, #tpu.memory_space<vmem>>, %arg3: memref<2x2x128xf32, #tpu.memory_space<vmem>>) attributes {dimension_semantics = [#tpu.dimension_semantics<parallel>], iteration_bounds = array<i64: 1>, scalar_prefetch = 0 : i64, scratch_operands = 0 : i64, tpu.core_type = #tpu.core_type<tc>, window_params = [{transform_indices = @transform_0, window_bounds = array<i64: 2, 2, 128>}, {transform_indices = @transform_1, window_bounds = array<i64: 2, 128>}, {transform_indices = @transform_2, window_bounds = array<i64: 2, 2, 128>}]} {
    %c0 = arith.constant 0 : index
    %c0_0 = arith.constant 0 : index
    %c0_1 = arith.constant 0 : index
    %0 = vector.load %arg1[%c0, %c0_0, %c0_1] : memref<2x2x128xf32, #tpu.memory_space<vmem>>, vector<2x2x128xf32>
    %c0_2 = arith.constant 0 : index
    %c0_3 = arith.constant 0 : index
    %1 = vector.load %arg2[%c0_2, %c0_3] : memref<2x128xf32, #tpu.memory_space<vmem>>, vector<2x128xf32>
    %2 = vector.shape_cast %1 : vector<2x128xf32> to vector<1x2x128xf32>
    %3 = vector.broadcast %2 : vector<1x2x128xf32> to vector<2x2x128xf32>
    %4 = arith.addf %0, %3 : vector<2x2x128xf32>
    %c0_4 = arith.constant 0 : index
    %c0_5 = arith.constant 0 : index
    %c0_6 = arith.constant 0 : index
    %5 = vector.load %arg3[%c0_4, %c0_5, %c0_6] : memref<2x2x128xf32, #tpu.memory_space<vmem>>, vector<2x2x128xf32>
    tpu.vector_store %arg3[%c0_4, %c0_5, %c0_6], %4 {strides = array<i32>} : memref<2x2x128xf32, #tpu.memory_space<vmem>>, vector<2x2x128xf32>,
    return
  }
  func.func @transform_0(%arg0: i32) -> (i32, i32, i32) {
    %c0_i32 = arith.constant 0 : i32
    %c0_i32_0 = arith.constant 0 : i32
    %c0_i32_1 = arith.constant 0 : i32
    return %c0_i32, %arg0, %c0_i32_0 : i32, i32, i32
  }
  func.func @transform_1(%arg0: i32) -> (i32, i32) {
    %c0_i32 = arith.constant 0 : i32
    %c0_i32_0 = arith.constant 0 : i32
    return %arg0, %c0_i32 : i32, i32
  }
  func.func @transform_2(%arg0: i32) -> (i32, i32, i32) {
    %c0_i32 = arith.constant 0 : i32
    %c0_i32_0 = arith.constant 0 : i32
    %c0_i32_1 = arith.constant 0 : i32
    return %c0_i32, %arg0, %c0_i32_0 : i32, i32, i32
  }
}

</mosaic_0001>

<bundles_post_ra>
// kernel: positional_encoding.1
= control target key start
LH: loop header
LB: loop body
LE: loop exit
PB: predicated region body
PF: predicated region fallthrough
CT: control target
= control target key end

     0   :  { %s52_s0 = inlined_call_operand.vmem [shape: f32[2,2,128], index: 0, kind: input, shape index: {}, may-alias: {0,2}]   ;;  %s53_s1 = inlined_call_operand.vmem [shape: f32[2,128], index: 1, kind: input, shape index: {}]   ;;  %s54_s2 = inlined_call_operand.vmem [shape: f32[2,2,128], index: 2, kind: output, shape index: {}, may-alias: {0,2}]  }
   0x1   :  { %v11_v0 = vld [vmem:[%s52_s0] sm:$0x3]  ;;  %v12_v2 = vld [vmem:[%s52_s0 + $0x2] sm:$0x3] }
   0x2   :  { %v13_v1 = vld [vmem:[%s53_s1] sm:$0x3] }
   0x3   :  { %v14_v3 = vadd.f32 %v13_v1, %v11_v0  ;;  %v15_v4 = vadd.f32 %v13_v1, %v12_v2 }
   0x5   :  { %16 = vst [vmem:[%s54_s2] sm:$0x3] %v14_v3  ;;  %17 = vst [vmem:[%s54_s2 + $0x2] sm:$0x3] %v15_v4 }

</bundles_post_ra>
